<compile_context>
chip_gen: v5e
topology: v5e:2x2
jax: 0.10.0
libtpu: 0.0.40
codegen_flags: <defaults>
</compile_context>

<pallas_src>
import functools

import jax
import jax.numpy as jnp
from jax.experimental import pallas as pl
from jax.experimental.pallas import tpu as pltpu


def _round_up(x, m):
    return ((x + m - 1) // m) * m


def _vmem_cap_bytes():
    """~75% of physical VMEM, capped at 100 MiB (v5e/v6e have 128 MiB)."""
    try:
        phys = int(pltpu.get_tpu_info().vmem_capacity_bytes)
    except Exception:
        phys = 64 << 20          # conservative: v7x per-TensorCore VMEM
    return min((phys * 3) // 4, 100 << 20)


def _pe_kernel_resident(x_ref, w_ref, b_ref, o_ref):
    # x_ref: (tm, K) bf16; w_ref: (K, Dp) bf16 (grid-invariant);
    # b_ref: (1, Dp) f32; o_ref: (tm, Dp) out dtype.
    acc = jnp.dot(x_ref[...], w_ref[...], preferred_element_type=jnp.float32)
    o_ref[...] = (acc + b_ref[...]).astype(o_ref.dtype)


def _pe_kernel_ktiled(x_ref, w_ref, b_ref, o_ref, acc_ref):
    # Fallback for configurations whose full weight does not fit in VMEM.
    k = pl.program_id(1)

    @pl.when(k == 0)
    def _():
        acc_ref[...] = jnp.zeros_like(acc_ref)

    acc_ref[...] += jnp.dot(x_ref[...], w_ref[...],
                            preferred_element_type=jnp.float32)

    @pl.when(k == pl.num_programs(1) - 1)
    def _():
        o_ref[...] = (acc_ref[...] + b_ref[...]).astype(o_ref.dtype)


def patch_embed_pallas(x, weight, bias, patch_size, tubelet_size, *,
                       tm=512, tk_max=512,
                       compute_dtype=jnp.bfloat16,
                       out_dtype=jnp.bfloat16):
    """Pallas PatchEmbed forward.

    Args:
      x:      (B, C, T, H, W) float32 (NCTHW, like PyTorch)
      weight: (D, C, tubelet, p, p)   Conv3d weight
      bias:   (D,)                    Conv3d bias
    Returns:
      (B, N, D) with N = (T // tubelet) * (H // p) * (W // p), dtype out_dtype.
    """
    B, C, T, H, W = x.shape
    D = weight.shape[0]
    p = patch_size
    nt, nh, nw = T // tubelet_size, H // p, W // p
    N = nt * nh * nw
    K = C * tubelet_size * p * p
    M = B * N

    # ---- glue: non-overlapping patch extraction -> (M, K) in bf16 (one fused
    # XLA cast+transpose; no extra pad copies).
    # TODO(synk): fuse this gather into the kernel (grid over (b, t', h'),
    # block (1, C, tubelet, p, W)) to avoid one HBM round trip of x.
    xp = (x.astype(compute_dtype)
            .reshape(B, C, nt, tubelet_size, nh, p, nw, p)
            .transpose(0, 2, 4, 6, 1, 3, 5, 7)   # (B, t', h', w', C, kt, kh, kw)
            .reshape(M, K))

    # Conv3d weight (D, C, kt, kh, kw) -> (K, D); bias stays f32 for the add.
    w2d = weight.reshape(D, K).T.astype(compute_dtype)
    b2d = bias.reshape(1, D).astype(jnp.float32)

    Dp = _round_up(D, 128)                  # lane-dense output / full MXU N
    if Dp != D:
        w2d = jnp.pad(w2d, ((0, 0), (0, Dp - D)))
        b2d = jnp.pad(b2d, ((0, 0), (0, Dp - D)))

    cb = jnp.dtype(compute_dtype).itemsize
    ob = jnp.dtype(out_dtype).itemsize
    cap = _vmem_cap_bytes()

    # M tile: multiple of 16 (bf16 sublane tile), clamped to the problem size
    # and shrunk until it fits the VMEM budget.  Ragged last M tile is handled
    # by the cdiv grid (OOB rows are dropped on store; rows are independent).
    tm = max(16, min(_round_up(tm, 16), _round_up(M, 16)))

    weight_resident = (K * Dp * cb) <= (16 << 20)

    if weight_resident:
        def need(t):
            return (2 * t * K * cb          # x blocks (double-buffered)
                    + 2 * K * Dp * cb       # weight (grid-invariant, not re-DMA'd)
                    + 2 * 8 * Dp * 4        # bias
                    + 2 * t * Dp * ob)      # output blocks
        while need(tm) > cap and tm > 16:
            tm = max(16, _round_up(tm // 2, 16))

        grid = (pl.cdiv(M, tm),)
        out = pl.pallas_call(
            _pe_kernel_resident,
            out_shape=jax.ShapeDtypeStruct((M, Dp), out_dtype),
            grid=grid,
            in_specs=[
                pl.BlockSpec((tm, K), lambda i: (i, 0)),
                pl.BlockSpec((K, Dp), lambda i: (0, 0)),   # resident weight
                pl.BlockSpec((1, Dp), lambda i: (0, 0)),
            ],
            out_specs=pl.BlockSpec((tm, Dp), lambda i: (i, 0)),
            compiler_params=pltpu.CompilerParams(
                dimension_semantics=("parallel",),
                vmem_limit_bytes=int(min(max(2 * need(tm), 32 << 20), cap)),
            ),
        )(xp, w2d, b2d)
    else:
        # ---- K-tiled fallback (very large K only): reduction axis last.
        tk = _round_up(min(tk_max, K), 128)
        Kp = _round_up(K, tk)
        if Kp != K:
            xp = jnp.pad(xp, ((0, 0), (0, Kp - K)))
            w2d = jnp.pad(w2d, ((0, Kp - K), (0, 0)))

        def need(t):
            return (2 * t * tk * cb + 2 * tk * Dp * cb + 2 * 8 * Dp * 4
                    + 2 * t * Dp * ob + t * Dp * 4)
        while need(tm) > cap and tm > 16:
            tm = max(16, _round_up(tm // 2, 16))

        grid = (pl.cdiv(M, tm), Kp // tk)
        out = pl.pallas_call(
            _pe_kernel_ktiled,
            out_shape=jax.ShapeDtypeStruct((M, Dp), out_dtype),
            grid=grid,
            in_specs=[
                pl.BlockSpec((tm, tk), lambda i, k: (i, k)),
                pl.BlockSpec((tk, Dp), lambda i, k: (k, 0)),
                pl.BlockSpec((1, Dp), lambda i, k: (0, 0)),
            ],
            out_specs=pl.BlockSpec((tm, Dp), lambda i, k: (i, 0)),
            scratch_shapes=[pltpu.VMEM((tm, Dp), jnp.float32)],
            compiler_params=pltpu.CompilerParams(
                dimension_semantics=("parallel", "arbitrary"),
                vmem_limit_bytes=int(min(max(2 * need(tm), 32 << 20), cap)),
            ),
        )(xp, w2d, b2d)

    if Dp != D:
        out = out[:, :D]
    # norm_layer=None -> Identity; flatten already realized by the (M, D) layout.
    return out.reshape(B, N, D)


def reference_patch_embed(x, weight, bias, patch_size, tubelet_size):
    """Pure-JAX reference using conv_general_dilated (matches torch Conv3d)."""
    p = patch_size
    y = jax.lax.conv_general_dilated(
        x, weight,
        window_strides=(tubelet_size, p, p),
        padding="VALID",
        dimension_numbers=("NCDHW", "OIDHW", "NCDHW"),
    )
    y = y + bias.reshape(1, -1, 1, 1, 1)
    B, D = y.shape[0], y.shape[1]
    y = y.reshape(B, D, -1)             # flatten(2)
    return jnp.transpose(y, (0, 2, 1))  # transpose(1, 2)


if __name__ == "__main__":
    # Small, shape-consistent config:
    #   img_size=16, patch_size=8, num_frames=2, tubelet_size=1,
    #   in_chans=4, embed_dim=32, batch=2.
    B, C, T, H, W = 2, 4, 2, 16, 16
    patch_size = 8
    tubelet_size = 1
    embed_dim = 32

    key = jax.random.PRNGKey(0)
    kx, kw, kb = jax.random.split(key, 3)

    x = jax.random.normal(kx, (B, C, T, H, W), dtype=jnp.float32)
    weight = jax.random.normal(
        kw, (embed_dim, C, tubelet_size, patch_size, patch_size),
        dtype=jnp.float32) * 0.02
    bias = jax.random.normal(kb, (embed_dim,), dtype=jnp.float32) * 0.02

    fn = jax.jit(functools.partial(
        patch_embed_pallas, patch_size=patch_size, tubelet_size=tubelet_size))
    out = jax.block_until_ready(fn(x, weight, bias))

    # Reference with the same bf16-rounded operands (kernel takes bf16 inputs,
    # accumulates in f32, emits bf16), so only rounding/order diffs remain.
    x_q = x.astype(jnp.bfloat16).astype(jnp.float32)
    w_q = weight.astype(jnp.bfloat16).astype(jnp.float32)
    ref = reference_patch_embed(x_q, w_q, bias, patch_size, tubelet_size)
    ref = jax.block_until_ready(ref)

    N = (T // tubelet_size) * (H // patch_size) * (W // patch_size)
    assert out.shape == (B, N, embed_dim), out.shape
    assert jnp.allclose(out.astype(jnp.float32), ref, atol=2e-2, rtol=2e-2), (
        "mismatch vs reference")

    print("KERNEL_OK")
</pallas_src>

<mosaic_0001>
module attributes {stable_mosaic.version = 11 : i64} {
  func.func @_pe_kernel_resident(%arg0: i32, %arg1: memref<16x256xbf16, #tpu.memory_space<vmem>>, %arg2: memref<256x128xbf16, #tpu.memory_space<vmem>>, %arg3: memref<1x128xf32, #tpu.memory_space<vmem>>, %arg4: memref<16x128xbf16, #tpu.memory_space<vmem>>) attributes {dimension_semantics = [#tpu.dimension_semantics<parallel>], iteration_bounds = array<i64: 1>, scalar_prefetch = 0 : i64, scratch_operands = 0 : i64, tpu.core_type = #tpu.core_type<tc>, window_params = [{transform_indices = @transform_0, window_bounds = array<i64: 16, 256>}, {pipeline_mode = #tpu.pipeline_mode<synchronous>, transform_indices = @transform_1, window_bounds = array<i64: 256, 128>}, {pipeline_mode = #tpu.pipeline_mode<synchronous>, transform_indices = @transform_2, window_bounds = array<i64: 1, 128>}, {transform_indices = @transform_3, window_bounds = array<i64: 16, 128>}]} {
    %c0 = arith.constant 0 : index
    %c0_0 = arith.constant 0 : index
    %0 = vector.load %arg1[%c0, %c0_0] : memref<16x256xbf16, #tpu.memory_space<vmem>>, vector<16x256xbf16>
    %c0_1 = arith.constant 0 : index
    %c0_2 = arith.constant 0 : index
    %1 = vector.load %arg2[%c0_1, %c0_2] : memref<256x128xbf16, #tpu.memory_space<vmem>>, vector<256x128xbf16>
    %cst = arith.constant dense<0.000000e+00> : vector<16x128xf32>
    %2 = tpu.matmul %0, %1, %cst {dimension_numbers = #tpu.dot_dimension_numbers<[1], [0], [0], [1], [0, 0, 1, 1], [], []>} : vector<16x256xbf16>, vector<256x128xbf16>, vector<16x128xf32> -> vector<16x128xf32>
    %c0_3 = arith.constant 0 : index
    %c0_4 = arith.constant 0 : index
    %3 = vector.load %arg3[%c0_3, %c0_4] : memref<1x128xf32, #tpu.memory_space<vmem>>, vector<1x128xf32>
    %4 = vector.broadcast %3 : vector<1x128xf32> to vector<16x128xf32>
    %5 = arith.addf %2, %4 : vector<16x128xf32>
    %6 = arith.truncf %5 : vector<16x128xf32> to vector<16x128xbf16>
    %c0_5 = arith.constant 0 : index
    %c0_6 = arith.constant 0 : index
    %7 = vector.load %arg4[%c0_5, %c0_6] : memref<16x128xbf16, #tpu.memory_space<vmem>>, vector<16x128xbf16>
    tpu.vector_store %arg4[%c0_5, %c0_6], %6 {strides = array<i32>} : memref<16x128xbf16, #tpu.memory_space<vmem>>, vector<16x128xbf16>,
    return
  }
  func.func @transform_0(%arg0: i32) -> (i32, i32) {
    %c0_i32 = arith.constant 0 : i32
    %c0_i32_0 = arith.constant 0 : i32
    return %arg0, %c0_i32 : i32, i32
  }
  func.func @transform_1(%arg0: i32) -> (i32, i32) {
    %c0_i32 = arith.constant 0 : i32
    %c0_i32_0 = arith.constant 0 : i32
    %c0_i32_1 = arith.constant 0 : i32
    return %c0_i32, %c0_i32_0 : i32, i32
  }
  func.func @transform_2(%arg0: i32) -> (i32, i32) {
    %c0_i32 = arith.constant 0 : i32
    %c0_i32_0 = arith.constant 0 : i32
    %c0_i32_1 = arith.constant 0 : i32
    return %c0_i32, %c0_i32_0 : i32, i32
  }
  func.func @transform_3(%arg0: i32) -> (i32, i32) {
    %c0_i32 = arith.constant 0 : i32
    %c0_i32_0 = arith.constant 0 : i32
    return %arg0, %c0_i32 : i32, i32
  }
}

</mosaic_0001>

<bundles_post_ra>
// kernel: patch_embed_pallas.1
= control target key start
LH: loop header
LB: loop body
LE: loop exit
PB: predicated region body
PF: predicated region fallthrough
CT: control target
= control target key end

     0   :  { %s376_s1 = inlined_call_operand.vmem [shape: bf16[256,128], index: 1, kind: input, shape index: {}]   ;;  %s377_s2 = inlined_call_operand.vmem [shape: f32[1,128], index: 2, kind: input, shape index: {}]   ;;  %s378_s0 = inlined_call_operand.vmem [shape: bf16[16,256], index: 0, kind: input, shape index: {}]   ;;  %s379_s3 = inlined_call_operand.vmem [shape: bf16[16,128], index: 3, kind: output, shape index: {}]  }
   0x1   :  { %v275_v0 = vld [vmem:[%s376_s1 + $0x38] sm:$0xff]  ;;  %v274_v2 = vld [vmem:[%s376_s1 + $0x30] sm:$0xff]  ;;  %v273_v4 = vld [vmem:[%s376_s1 + $0x28] sm:$0xff] }
   0x2   :  { %v283_v1 = vld [vmem:[%s376_s1 + $0x78] sm:$0xff]  ;;  %158 = vmatpush.bf16.msra.mxu0 %v275_v0  ;;  %v282_v3 = vld [vmem:[%s376_s1 + $0x70] sm:$0xff]  ;;  %v281_v5 = vld [vmem:[%s376_s1 + $0x68] sm:$0xff] }
   0x3   :  { %172 = vmatpush.bf16.msra.mxu1 %v283_v1  ;;  %v272_v6 = vld [vmem:[%s376_s1 + $0x20] sm:$0xff]  ;;  %v271_v8 = vld [vmem:[%s376_s1 + $0x18] sm:$0xff]  ;;  %v270_v10 = vld [vmem:[%s376_s1 + $0x10] sm:$0xff] }
   0x4   :  { %v280_v7 = vld [vmem:[%s376_s1 + $0x60] sm:$0xff]  ;;  %v279_v9 = vld [vmem:[%s376_s1 + $0x58] sm:$0xff]  ;;  %v278_v11 = vld [vmem:[%s376_s1 + $0x50] sm:$0xff] }
   0x5   :  { %v269_v12 = vld [vmem:[%s376_s1 + $0x8] sm:$0xff]  ;;  %v268_v14 = vld [vmem:[%s376_s1] sm:$0xff] }
   0x6   :  { %159 = vmatpush.bf16.msra.mxu0 %v274_v2  ;;  %v277_v13 = vld [vmem:[%s376_s1 + $0x48] sm:$0xff]  ;;  %v276_v15 = vld [vmem:[%s376_s1 + $0x40] sm:$0xff] }
   0x7   :  { %173 = vmatpush.bf16.msra.mxu1 %v282_v3  ;;  %v196_v16 = vld [vmem:[%s378_s0] sm:$0xf]  ;;  %v267_v17 = vld [vmem:[%s378_s0 + $0x4] sm:$0xf0]  ;;  %v266_v18 = vld [vmem:[%s378_s0 + $0x4] sm:$0xf] }
   0x8   :  { %v198_v19 = vld [vmem:[%s378_s0 + $0x8] sm:$0xf0]  ;;  %v197_v20 = vor.u32 %v267_v17, %v196_v16  ;;  %v289_v24 = vld [vmem:[%s377_s2] ss:$0 sm:$0xff] }
   0x9   :  { %v201_v21 = vor.u32 %v266_v18, %v198_v19 }
   0xa   :  { %160 = vmatpush.bf16.msra.mxu0 %v273_v4 }
   0xb   :  { %174 = vmatpush.bf16.msra.mxu1 %v281_v5 }
   0xe   :  { %161 = vmatpush.bf16.msra.mxu0 %v272_v6 }
   0xf   :  { %175 = vmatpush.bf16.msra.mxu1 %v280_v7 }
  0x12   :  { %162 = vmatpush.bf16.msra.mxu0 %v271_v8 }
  0x13   :  { %176 = vmatpush.bf16.msra.mxu1 %v279_v9 }
  0x16   :  { %163 = vmatpush.bf16.msra.mxu0 %v270_v10 }
  0x17   :  { %177 = vmatpush.bf16.msra.mxu1 %v278_v11 }
  0x1a   :  { %164 = vmatpush.bf16.msra.mxu0 %v269_v12 }
  0x1b   :  { %178 = vmatpush.bf16.msra.mxu1 %v277_v13 }
  0x1e   :  { %165 = vmatpush.bf16.msra.mxu0 %v268_v14 }
  0x1f   :  { %179 = vmatpush.bf16.msra.mxu1 %v276_v15 }
  0x21   :  { %166 = vmatmul.bf16.vlgmr.msra.gmra.mxu0 %v197_v20 }
  0x22   :  { %180 = vmatmul.bf16.vlgmr.msra.gmra.mxu1 %v201_v21 }
  0x9e   :  { %v167_v22 = vpop.f32.mrf.mxu0 }
  0x9f   :  { %v181_v23 = vpop.f32.mrf.mxu1  ;;  %v168_v25 = vadd.f32 %v289_v24, %v167_v22 }
  0xa1   :  { %v182_v29 = vadd.f32 %v181_v23, %v168_v25 }
  0xa6   :  { %v169_v26 = vpop.f32.mrf.mxu0 }
  0xa7   :  { %v170_v27 = vadd.f32 %v289_v24, %v169_v26  ;;  %v183_v28 = vpop.f32.mrf.mxu1 }
  0xa9   :  { %v184_v30 = vadd.f32 %v183_v28, %v170_v27 }
  0xab   :  { %v287_v31 = vpack.c.bf16 %v184_v30, %v182_v29 }
  0xad   :  { %288 = vst [vmem:[%s379_s3] sm:$0xff] %v287_v31  }

</bundles_post_ra>
